<compile_context>
chip_gen: v7x
topology: tpu7x:2x2x1
jax: 0.10.0
libtpu: 0.0.40
codegen_flags: <defaults>
</compile_context>

<pallas_src>
import jax
import jax.numpy as jnp
from jax import lax
from jax.experimental import pallas as pl
from jax.experimental.pallas import tpu as pltpu


def _casrel_kernel(e_ref, m_ref, w_ref, b_ref, out_ref):
    bt, s, d = e_ref.shape
    npad = w_ref.shape[-1]

    e = e_ref[...]                      # (Bt, S, D)  compute dtype (bf16/f32)
    m = m_ref[...]                      # (Bt, 1, S)  f32 = 0.5*(sub_head + sub_tail)
    w = w_ref[...]                      # (D, Npad)   compute dtype, packed [w_sh|w_st|w_oh|w_ot|0]
    b = b_ref[...]                      # (1, Npad)   f32 packed biases

    # Single fused lane-dense projection on the MXU (f32 accumulation).
    e_flat = e.reshape(bt * s, d)
    l = jnp.dot(e_flat, w, preferred_element_type=jnp.float32)        # (Bt*S, Npad)
    l3 = l.reshape(bt, s, npad)

    # Rank-1 correction for the obj columns: (m@e)@W == m@(e@W).
    corr = jnp.einsum("bks,bsn->bkn", m, l3,
                      preferred_element_type=jnp.float32)             # (Bt, 1, Npad)

    # Columns [0,1] are the sub head/tail logits (no subject-span correction);
    # columns [2, 2+2R) are obj head/tail logits (correction applied).
    col = lax.broadcasted_iota(jnp.int32, (1, 1, npad), 2)
    bias_plus_corr = jnp.where(col < 2, 0.0, corr) + b                # (Bt, 1, Npad) f32

    # One broadcast add over the slab + sigmoid, all in f32 (v5e-safe epilogue).
    logits = l3 + bias_plus_corr                                      # (Bt, S, Npad)

    # TODO(synk): `self.sub_attention` / `self.obj_attention` (attention[config.attention])
    # are undefined external modules; subject logits pass through unchanged here.
    out_ref[...] = jax.nn.sigmoid(logits).astype(out_ref.dtype)


def pack_params(params, npad, dtype=jnp.float32):
    """Pack the four Linear layers into one lane-dense weight + one bias row."""
    d = params["w_sh"].shape[0]
    r = params["w_oh"].shape[1]
    w = jnp.zeros((d, npad), jnp.float32)
    w = w.at[:, 0:1].set(params["w_sh"])
    w = w.at[:, 1:2].set(params["w_st"])
    w = w.at[:, 2:2 + r].set(params["w_oh"])
    w = w.at[:, 2 + r:2 + 2 * r].set(params["w_ot"])
    b = jnp.zeros((1, npad), jnp.float32)
    b = b.at[:, 0:1].set(params["b_sh"])
    b = b.at[:, 1:2].set(params["b_st"])
    b = b.at[:, 2:2 + r].set(params["b_oh"])
    b = b.at[:, 2 + r:2 + 2 * r].set(params["b_ot"])
    return w.astype(dtype), b          # bias stays f32 (added in the f32 epilogue)


def _default_vmem_limit_bytes():
    # ~3/4 of physical VMEM, capped at 100 MiB.  Fallback (no hw query) assumes
    # the smallest generation (v7x: 64 MiB per TensorCore) -> 48 MiB, safe on all.
    try:
        phys = int(pltpu.get_tpu_info().vmem_capacity_bytes)
    except Exception:
        phys = 64 * 1024 * 1024
    return int(min((phys * 3) // 4, 100 * 1024 * 1024))


def casrel_forward(encoded_text, sub_head, sub_tail, params, *,
                   block_b=None,
                   compute_dtype=jnp.bfloat16,   # MXU operand dtype (f32 acc always)
                   out_dtype=jnp.float32,        # fused-slab / head output dtype
                   vmem_limit_bytes=None,
                   return_fused=False):
    """encoded_text: [B, S, D]; sub_head/sub_tail: [B, S] span indicators."""
    B, S, D = encoded_text.shape
    R = params["w_oh"].shape[1]
    n_valid = 2 + 2 * R
    npad = 128 * pl.cdiv(n_valid, 128)            # lane-dense fused output width

    if vmem_limit_bytes is None:
        vmem_limit_bytes = _default_vmem_limit_bytes()

    w_packed, b_packed = pack_params(params, npad, dtype=compute_dtype)

    # torch: data['sub_head'].unsqueeze(1), data['sub_tail'].unsqueeze(1);
    # fold the 0.5 average into a single span mask (kept f32 for accuracy).
    m = (0.5 * (sub_head + sub_tail))[:, None, :].astype(jnp.float32)   # (B, 1, S)

    # Stream activations in the MXU compute dtype (halves the dominant HBM stream
    # when bf16) and avoid any in-kernel cast.
    e_in = encoded_text.astype(compute_dtype)

    bytes_in = jnp.dtype(compute_dtype).itemsize
    bytes_out = jnp.dtype(out_dtype).itemsize

    if block_b is None:
        budget = int(vmem_limit_bytes * 0.75)     # headroom for compiler scratch
        # W/b are resident but still double-buffered by the pipeline.
        # TODO(synk): pipeline_mode=pl.Buffered(1) on the constant W/b specs would
        # reclaim this double buffer; kept default for lowering robustness.
        resident = 2 * (D * npad * bytes_in + npad * 4)
        per_item = (2 * S * D * bytes_in          # encoded_text (double-buffered)
                    + 2 * S * npad * bytes_out    # fused output slab (double-buffered)
                    + 2 * S * 4                   # span mask
                    + 3 * S * npad * 4)           # f32 intermediates: l, logits, sigmoid
        avail = max(budget - resident, per_item)
        block_b = max(1, min(B, avail // per_item))
        # Keep at least 2 grid steps so dimension_semantics=("parallel",) has
        # something to shard across v7x's two TensorCores.
        if B >= 2:
            block_b = min(block_b, pl.cdiv(B, 2))
    Bt = int(block_b)

    Bp = Bt * pl.cdiv(B, Bt)
    if Bp != B:
        pad = Bp - B
        e_in = jnp.pad(e_in, ((0, pad), (0, 0), (0, 0)))
        m = jnp.pad(m, ((0, pad), (0, 0), (0, 0)))

    fused = pl.pallas_call(
        _casrel_kernel,
        out_shape=jax.ShapeDtypeStruct((Bp, S, npad), out_dtype),
        grid_spec=pltpu.PrefetchScalarGridSpec(
            num_scalar_prefetch=0,
            grid=(Bp // Bt,),
            in_specs=[
                pl.BlockSpec((Bt, S, D), lambda i: (i, 0, 0)),    # encoded_text block
                pl.BlockSpec((Bt, 1, S), lambda i: (i, 0, 0)),    # span mask block
                pl.BlockSpec((D, npad), lambda i: (0, 0)),        # packed weights (resident)
                pl.BlockSpec((1, npad), lambda i: (0, 0)),        # packed biases (resident)
            ],
            out_specs=pl.BlockSpec((Bt, S, npad), lambda i: (i, 0, 0)),
        ),
        compiler_params=pltpu.CompilerParams(
            dimension_semantics=("parallel",),                    # both TCs on v7x
            vmem_limit_bytes=int(vmem_limit_bytes),
        ),
    )(e_in, m, w_packed, b_packed)

    fused = fused[:B]
    if return_fused:
        # Fused lane-dense slab; columns: [sub_head | sub_tail | obj_heads | obj_tails | pad].
        return fused
    pred_sub_heads = fused[:, :, 0:1]
    pred_sub_tails = fused[:, :, 1:2]
    pred_obj_heads = fused[:, :, 2:2 + R]
    pred_obj_tails = fused[:, :, 2 + R:2 + 2 * R]
    return pred_sub_heads, pred_sub_tails, pred_obj_heads, pred_obj_tails


def init_params(key, D, R):
    ks = jax.random.split(key, 8)
    scale = 1.0 / jnp.sqrt(D)
    return {
        "w_sh": jax.random.uniform(ks[0], (D, 1), jnp.float32, -scale, scale),
        "b_sh": jax.random.uniform(ks[1], (1, 1), jnp.float32, -scale, scale),
        "w_st": jax.random.uniform(ks[2], (D, 1), jnp.float32, -scale, scale),
        "b_st": jax.random.uniform(ks[3], (1, 1), jnp.float32, -scale, scale),
        "w_oh": jax.random.uniform(ks[4], (D, R), jnp.float32, -scale, scale),
        "b_oh": jax.random.uniform(ks[5], (1, R), jnp.float32, -scale, scale),
        "w_ot": jax.random.uniform(ks[6], (D, R), jnp.float32, -scale, scale),
        "b_ot": jax.random.uniform(ks[7], (1, R), jnp.float32, -scale, scale),
    }


def reference_forward(encoded_text, sub_head, sub_tail, p):
    # pure-JAX f32 reference mirroring the torch forward (sanity check)
    sh = encoded_text @ p["w_sh"] + p["b_sh"]
    st = encoded_text @ p["w_st"] + p["b_st"]
    psh, pst = jax.nn.sigmoid(sh), jax.nn.sigmoid(st)
    shm = sub_head[:, None, :]
    stm = sub_tail[:, None, :]
    sub = (shm @ encoded_text + stm @ encoded_text) * 0.5
    e2 = encoded_text + sub
    poh = jax.nn.sigmoid(e2 @ p["w_oh"] + p["b_oh"])
    pot = jax.nn.sigmoid(e2 @ p["w_ot"] + p["b_ot"])
    return psh, pst, poh, pot


if __name__ == "__main__":
    B, S, D, R = 2, 8, 128, 8   # batch, seq, hidden (stand-in for bert_dim), rel_num

    key = jax.random.PRNGKey(0)
    k_e, k_h, k_t, k_p = jax.random.split(key, 4)

    encoded_text = jax.random.normal(k_e, (B, S, D), jnp.float32)
    # one-hot-ish span indicators, as produced from data['sub_head'] / data['sub_tail']
    head_idx = jax.random.randint(k_h, (B,), 0, S)
    tail_idx = jax.random.randint(k_t, (B,), 0, S)
    sub_head = jax.nn.one_hot(head_idx, S, dtype=jnp.float32)
    sub_tail = jax.nn.one_hot(tail_idx, S, dtype=jnp.float32)

    params = init_params(k_p, D, R)
    refs = reference_forward(encoded_text, sub_head, sub_tail, params)
    names = ("pred_sub_heads", "pred_sub_tails", "pred_obj_heads", "pred_obj_tails")

    # 1) Exact-precision path (f32 MXU operands / f32 output) — tight check.
    outs32 = casrel_forward(encoded_text, sub_head, sub_tail, params,
                            compute_dtype=jnp.float32, out_dtype=jnp.float32)
    outs32 = jax.block_until_ready(outs32)
    for name, o, r in zip(names, outs32, refs):
        assert o.shape == r.shape and o.dtype == r.dtype, name
        err = float(jnp.max(jnp.abs(o - r)))
        assert err < 1e-4, (name, err)

    # 2) Recommended perf config (bf16 MXU operands + bf16 output slab) — loose check.
    outsbf = casrel_forward(encoded_text, sub_head, sub_tail, params,
                            compute_dtype=jnp.bfloat16, out_dtype=jnp.bfloat16)
    outsbf = jax.block_until_ready(outsbf)
    for name, o, r in zip(names, outsbf, refs):
        assert o.shape == r.shape, name
        err = float(jnp.max(jnp.abs(o.astype(jnp.float32) - r)))
        assert err < 3e-2, (name, err)

    print("KERNEL_OK")
</pallas_src>

<mosaic_0001>
module attributes {stable_mosaic.version = 11 : i64} {
  func.func @_casrel_kernel(%arg0: i32, %arg1: memref<1x8x128xf32, #tpu.memory_space<vmem>>, %arg2: memref<1x1x8xf32, #tpu.memory_space<vmem>>, %arg3: memref<128x128xf32, #tpu.memory_space<vmem>>, %arg4: memref<1x128xf32, #tpu.memory_space<vmem>>, %arg5: memref<1x8x128xf32, #tpu.memory_space<vmem>>) attributes {dimension_semantics = [#tpu.dimension_semantics<parallel>], iteration_bounds = array<i64: 2>, scalar_prefetch = 0 : i64, scratch_operands = 0 : i64, tpu.core_type = #tpu.core_type<tc>, window_params = [{transform_indices = @transform_0, window_bounds = array<i64: 1, 8, 128>}, {transform_indices = @transform_1, window_bounds = array<i64: 1, 1, 8>}, {pipeline_mode = #tpu.pipeline_mode<synchronous>, transform_indices = @transform_2, window_bounds = array<i64: 128, 128>}, {pipeline_mode = #tpu.pipeline_mode<synchronous>, transform_indices = @transform_3, window_bounds = array<i64: 1, 128>}, {transform_indices = @transform_4, window_bounds = array<i64: 1, 8, 128>}]} {
    %c0 = arith.constant 0 : index
    %c0_0 = arith.constant 0 : index
    %c0_1 = arith.constant 0 : index
    %0 = vector.load %arg1[%c0, %c0_0, %c0_1] : memref<1x8x128xf32, #tpu.memory_space<vmem>>, vector<1x8x128xf32>
    %c0_2 = arith.constant 0 : index
    %c0_3 = arith.constant 0 : index
    %c0_4 = arith.constant 0 : index
    %1 = vector.load %arg2[%c0_2, %c0_3, %c0_4] : memref<1x1x8xf32, #tpu.memory_space<vmem>>, vector<1x1x8xf32>
    %c0_5 = arith.constant 0 : index
    %c0_6 = arith.constant 0 : index
    %2 = vector.load %arg3[%c0_5, %c0_6] : memref<128x128xf32, #tpu.memory_space<vmem>>, vector<128x128xf32>
    %c0_7 = arith.constant 0 : index
    %c0_8 = arith.constant 0 : index
    %3 = vector.load %arg4[%c0_7, %c0_8] : memref<1x128xf32, #tpu.memory_space<vmem>>, vector<1x128xf32>
    %4 = vector.shape_cast %0 : vector<1x8x128xf32> to vector<8x128xf32>
    %cst = arith.constant dense<0.000000e+00> : vector<8x128xf32>
    %5 = tpu.matmul %4, %2, %cst {dimension_numbers = #tpu.dot_dimension_numbers<[1], [0], [0], [1], [0, 0, 1, 1], [], []>} : vector<8x128xf32>, vector<128x128xf32>, vector<8x128xf32> -> vector<8x128xf32>
    %6 = vector.shape_cast %5 : vector<8x128xf32> to vector<1x8x128xf32>
    "tpu.trace_start"() <{level = 10 : i32, message = "bks,bsn->bkn"}> : () -> ()
    %cst_9 = arith.constant dense<0.000000e+00> : vector<1x1x128xf32>
    %7 = tpu.matmul %1, %6, %cst_9 {dimension_numbers = #tpu.dot_dimension_numbers<[2], [1], [1], [2], [0, 0, 0, 1, 1, 2], [0], [0]>} : vector<1x1x8xf32>, vector<1x8x128xf32>, vector<1x1x128xf32> -> vector<1x1x128xf32>
    "tpu.trace_stop"() : () -> ()
    %8 = tpu.iota {dimensions = array<i32: 2>} : vector<1x1x128xi32>
    %c2_i32 = arith.constant 2 : i32
    %9 = vector.broadcast %c2_i32 : i32 to vector<1x1x128xi32>
    %10 = arith.cmpi slt, %8, %9 : vector<1x1x128xi32>
    %cst_10 = arith.constant 0.000000e+00 : f32
    %11 = vector.broadcast %cst_10 : f32 to vector<1x1x128xf32>
    %12 = arith.select %10, %11, %7 : vector<1x1x128xi1>, vector<1x1x128xf32>
    %13 = vector.shape_cast %3 : vector<1x128xf32> to vector<1x1x128xf32>
    %14 = arith.addf %12, %13 : vector<1x1x128xf32>
    %15 = vector.broadcast %14 : vector<1x1x128xf32> to vector<1x8x128xf32>
    %16 = arith.addf %6, %15 : vector<1x8x128xf32>
    %17 = arith.negf %16 : vector<1x8x128xf32>
    %18 = math.exp %17 : vector<1x8x128xf32>
    %cst_11 = arith.constant 1.000000e+00 : f32
    %19 = vector.broadcast %cst_11 : f32 to vector<1x8x128xf32>
    %20 = arith.addf %19, %18 : vector<1x8x128xf32>
    %21 = arith.divf %19, %20 : vector<1x8x128xf32>
    %c0_12 = arith.constant 0 : index
    %c0_13 = arith.constant 0 : index
    %c0_14 = arith.constant 0 : index
    %22 = vector.load %arg5[%c0_12, %c0_13, %c0_14] : memref<1x8x128xf32, #tpu.memory_space<vmem>>, vector<1x8x128xf32>
    tpu.vector_store %arg5[%c0_12, %c0_13, %c0_14], %21 {strides = array<i32>} : memref<1x8x128xf32, #tpu.memory_space<vmem>>, vector<1x8x128xf32>,
    return
  }
  func.func @transform_0(%arg0: i32) -> (i32, i32, i32) {
    %c0_i32 = arith.constant 0 : i32
    %c0_i32_0 = arith.constant 0 : i32
    %c0_i32_1 = arith.constant 0 : i32
    return %arg0, %c0_i32, %c0_i32_0 : i32, i32, i32
  }
  func.func @transform_1(%arg0: i32) -> (i32, i32, i32) {
    %c0_i32 = arith.constant 0 : i32
    %c0_i32_0 = arith.constant 0 : i32
    %c0_i32_1 = arith.constant 0 : i32
    return %arg0, %c0_i32, %c0_i32_0 : i32, i32, i32
  }
  func.func @transform_2(%arg0: i32) -> (i32, i32) {
    %c0_i32 = arith.constant 0 : i32
    %c0_i32_0 = arith.constant 0 : i32
    %c0_i32_1 = arith.constant 0 : i32
    return %c0_i32, %c0_i32_0 : i32, i32
  }
  func.func @transform_3(%arg0: i32) -> (i32, i32) {
    %c0_i32 = arith.constant 0 : i32
    %c0_i32_0 = arith.constant 0 : i32
    %c0_i32_1 = arith.constant 0 : i32
    return %c0_i32, %c0_i32_0 : i32, i32
  }
  func.func @transform_4(%arg0: i32) -> (i32, i32, i32) {
    %c0_i32 = arith.constant 0 : i32
    %c0_i32_0 = arith.constant 0 : i32
    %c0_i32_1 = arith.constant 0 : i32
    return %arg0, %c0_i32, %c0_i32_0 : i32, i32, i32
  }
}

</mosaic_0001>

<bundles_post_ra>
// kernel: tpu_custom_call.1
= control target key start
LH: loop header
LB: loop body
LE: loop exit
PB: predicated region body
PF: predicated region fallthrough
CT: control target
= control target key end

     0   :  { %9 = vsyncpa [#allocation3], 0  ;;  %s1064_s0 = inlined_call_operand.hbm [shape: f32[2,8,128], index: 0, kind: input, shape index: {}]   ;;  %s1065_s1 = inlined_call_operand.vmem [shape: f32[2,1,8], index: 1, kind: input, shape index: {}]   ;;  %s1066_s2 = inlined_call_operand.hbm [shape: f32[128,128], index: 2, kind: input, shape index: {}]   ;;  %s1067_s3 = inlined_call_operand.vmem [shape: f32[1,128], index: 3, kind: input, shape index: {}]   ;;  %s1068_s4 = inlined_call_operand.hbm [shape: f32[2,8,128], index: 4, kind: output, shape index: {}]  }
   0x1   :  { %11 = vsyncpa [#allocation3 + $0x1], 0 }
   0x2   :  { %12 = vsyncpa [#allocation6], 0 }
   0x3   :  { %13 = vsyncpa [#allocation4], 0 }
   0x4   :  { %15 = vsyncpa [#allocation4 + $0x1], 0  ;;  %s853_s15 = smov 0   ;;  %s855_s16 = smov 0  }
   0x5   :  { %s857_s17 = smov 0   ;;  %s859_s18 = smov 0  }
   0x6 LB: > { %s874_s19 = sadd.s32 4294967295, %s818_s18   ;;  %s525_s20 = sadd.s32 4294967294, %s818_s18   ;;  %s818_s18 = sphi %s859_s18, %s1088_s18   ;;  %s814_s17 = sphi %s857_s17, %s1087_s17   ;;  %s810_s16 = sphi %s855_s16, %s1086_s16   ;;  %s806_s15 = sphi %s853_s15, %s1085_s15  }
   0x7   : > { %p41_p0 = scmp.ne.s32.totalorder %s810_s16, %s806_s15  ;;  %p1069_p1 = scmp.eq.s32.totalorder %s874_s19, 0 }
   0x8   : > { %p139_p3 = scmp.eq.s32.totalorder %s525_s20, 1  ;;  %p526_p5 = scmp.ge.s32.totalorder %s818_s18, 1 }
   0x9   : > { %p883_p4 = por %p1069_p1, %p41_p0  ;;  %p146_p7 = scmp.lt.s32.totalorder %s818_s18, 3 }
   0xa   : > { %p888_p6 = por %p139_p3, %p41_p0  ;;  %s820_s24 = smov [#allocation5]  }
   0xb   : > { %s1072_s21 = scalar_select %p883_p4, 1, 0 }
   0xc   : > { %s1073_s22 = scalar_select %p888_p6, 1, 0 }
   0xd   : > { %p893_p8 = pnand %p526_p5, %p146_p7  ;;  %s158_s25 = sshll.u32 %s820_s24, 4  ;;  %s897_s25 = int_to_ptr.vmem [resolvable:$true] %s158_s25 }
   0xe   : > { %s909_s27 = sadd.s32 1, %s818_s18   ;;  %s28_s28 = sadd.s32 1, %s814_s17 }
   0xf   : > { %s1074_s23 = scalar_select %p893_p8, 1, 0 }
  0x10   : > { %p632_p9 = pneg %p893_p8  ;;  %s25_s29 = ssub.s32 %s818_s18, %s909_s27 }
  0x11   : > { %s690_s6 = scalar_lea.hbm %s1066_s2, 2048 }
  0x12   : > { %p904_p11 = pnand %p632_p9, %p1069_p1  ;;  %p691_p12 = scmp.ne.s32.totalorder %s1066_s2, %s690_s6 }
  0x13   : > { %p697_p5 = scmp.lt.u32.totalorder %s690_s6, %s1066_s2 }
  0x14   : > { %p692_p13 = pneg %p904_p11 }
  0x16   : > { %p693_p0 = pnand %p692_p13, %p691_p12 }
  0x18   : > { %p694_p3 = pneg %p693_p0 }
  0x1a   : > { %p699_p7 = pnand %p697_p5, %p694_p3 }
  0x1c   : > { %702 = shalt.err (!%p699_p7)
}
  0x1d   : > { %s703_s11 = scalar_lea.vmem %s897_s25, 2048  ;;  %p711_p2 = scmp.lt.s32.totalorder %s897_s25, %s897_s25 }
  0x1e   : > { %p704_p9 = scmp.ne.s32.totalorder %s897_s25, %s703_s11  ;;  %p712_p6 = scmp.lt.s32.totalorder %s703_s11, %s703_s11 }
  0x20   : > { %p706_p10 = pnand %p704_p9, %p692_p13  ;;  %p713_p4 = por %p712_p6, %p711_p2 }
  0x22   : > { %p707_p1 = pneg %p706_p10 }
  0x24   : > { %p714_p8 = pnand %p713_p4, %p707_p1 }
  0x26   : > { %717 = shalt.err (!%p714_p8)
}
  0x27   : > { %s821_s12 = smov 128   ;;  %s822_s13 = smov 8  }
  0x28   : > { %635 = dma.hbm_to_vmem [thread:$0]  (!%p904_p11), %s1066_s2, 2048, %s897_s25, [#allocation6], %s821_s12, %s821_s12, %s822_s13  }
  0x29   : > { %p26_p2 = scmp.eq.s32.totalorder %s25_s29, 0  ;;  %p35_p1 = scmp.ne.s32.totalorder %s814_s17, %s810_s16 }
  0x2a   : > { %p36_p4 = scmp.eq.s32.totalorder %s818_s18, 0  ;;  %p645_p6 = scmp.lt.s32.totalorder %s818_s18, 2 }
  0x2b   : > { %s940_s24 = scalar_select %p26_p2, %s814_s17, %s28_s28  }
  0x2c   : > { %p37_p8 = por %p36_p4, %p35_p1  ;;  %p1076_p10 = scmp.eq.s32.totalorder %s874_s19, 1 }
  0x2d   : > { %s175_s5 = sand.u32 1, %s814_s17   ;;  %s530_s6 = sshll.u32 %s818_s18, 7 }
  0x2e   : > { %p944_p12 = por %p1076_p10, %p35_p1  ;;  %s529_s7 = sshll.u32 %s175_s5, 3 }
  0x2f   : > { %s953_s9 = scalar_lea.hbm %s1064_s0, %s530_s6  ;;  %s179_s25 = scalar_lea.vmem [#allocation2], %s529_s7 }
  0x30   : > { %s186_s28 = sshll.u32 %s179_s25, 4  ;;  %p955_p11 = pnand %p645_p6, %p37_p8  ;;  %s959_s28 = int_to_ptr.vmem [resolvable:$true] %s186_s28 }
  0x31   : > { %s176_s10 = scalar_lea.sflag [#allocation3], %s175_s5  ;;  %s718_s11 = scalar_lea.hbm %s953_s9, 128 }
  0x32   : > { %p719_p13 = scmp.ne.s32.totalorder %s953_s9, %s718_s11  ;;  %p720_p0 = pneg %p955_p11 }
  0x33   : > { %s723_s14 = scalar_lea.hbm %s1064_s0, 256  ;;  %p724_p7 = scmp.lt.u32.totalorder %s953_s9, %s1064_s0 }
  0x34   : > { %p721_p3 = pnand %p720_p0, %p719_p13  ;;  %p725_p9 = scmp.lt.u32.totalorder %s723_s14, %s718_s11 }
  0x35   : > { %p727_p1 = scmp.lt.u32.totalorder %s718_s11, %s953_s9 }
  0x36   : > { %p722_p5 = pneg %p721_p3  ;;  %p726_p2 = por %p725_p9, %p724_p7 }
  0x38   : > { %p728_p4 = por %p727_p1, %p726_p2 }
  0x3a   : > { %p729_p6 = pnand %p728_p4, %p722_p5 }
  0x3c   : > { %732 = shalt.err (!%p729_p6)
}
  0x3d   : > { %s733_s5 = scalar_lea.vmem %s959_s28, 128  ;;  %s823_s7 = smov [#allocation2]  }
  0x3e   : > { %p734_p8 = scmp.ne.s32.totalorder %s959_s28, %s733_s5  ;;  %s738_s26 = sshll.u32 %s823_s7, 4  ;;  %s739_s26 = int_to_ptr.vmem [resolvable:$false] %s738_s26 }
  0x3f   : > { %s740_s8 = scalar_lea.vmem %s739_s26, 256  ;;  %p741_p3 = scmp.lt.s32.totalorder %s959_s28, %s739_s26 }
  0x40   : > { %p736_p10 = pnand %p734_p8, %p720_p0  ;;  %p742_p7 = scmp.lt.s32.totalorder %s740_s8, %s733_s5 }
  0x42   : > { %p737_p13 = pneg %p736_p10  ;;  %p743_p9 = por %p742_p7, %p741_p3 }
  0x44   : > { %p744_p2 = pnand %p743_p9, %p737_p13 }
  0x46   : > { %747 = shalt.err (!%p744_p2)
}
  0x47   : > { %639 = dma.hbm_to_vmem [thread:$0]  (!%p955_p11), %s953_s9, 128, %s959_s28, %s176_s10  }
  0x48   : > { %p1079_p5 = scmp.ne.s32.totalorder %s1074_s23, 0 }
  0x49   : > { %s989_s25 = sand.u32 (!%p1079_p5), 1, %s810_s16   ;;  %p1080_p0 = scmp.ne.s32.totalorder (!%p1079_p5), %s1072_s21, 0 }
  0x4a   : > { %201 = sbr.rel (%p1079_p5) target bundleno = 591 (0x24f), region = 36  ;;  %s532_s11 = sshll.u32 (!%p1079_p5), %s989_s25, 3 }
  0x4b   : > { %s204_s12 = scalar_lea.sflag (!%p1079_p5), [#allocation3], %s989_s25  ;;  %s995_s13 = scalar_lea.vmem (!%p1079_p5), [#allocation2], %s532_s11 }
  0x51   : > { %793 = dma.done.wait (%p1080_p0), %s204_s12, 128  }
  0x52   : > { %795 = vsyncadd (%p1080_p0), %s204_s12, 4294967168  ;;  %p1081_p11 = scmp.eq.s32.totalorder %s874_s19, 0 }
  0x54   : > { %797 = dma.done.wait (%p1081_p11), [#allocation6], 2048   ;;  %p1082_p1 = pmov %p1081_p11 }
  0x55   : > { %v824_v0 = vmov 0.0|0.0   ;;  %vm825_vm0 = vmmov 0   ;;  %v826_v1 = vmov 0.0   ;;  %v244_v2 = vld [vmem:[#allocation5] sm:$0xff]  ;;  %v245_v3 = vld [vmem:[#allocation5 + $0x8] sm:$0xff]  ;;  %v246_v4 = vld [vmem:[#allocation5 + $0x10] sm:$0xff]  ;;  %v405_v30 = vlaneseq }
  0x56   : > { %799 = vsyncadd (%p1082_p1), [#allocation6], 4294965248  ;;  %600 = vmatprep.subr.bf16.mxu0 %v824_v0  ;;  %592 = vmatprep.mubr.msk.f32.mxu0 %vm825_vm0, %v826_v1  ;;  %v601_v5 = vpack.c.bf16 %v245_v3, %v244_v2  ;;  %v247_v6 = vld [vmem:[#allocation5 + $0x18] sm:$0xff]  ;;  %v248_v8 = vld [vmem:[#allocation5 + $0x20] sm:$0xff]  ;;  %p239_p4 = scmp.lt.s32.totalorder %s874_s19, 1  ;;  %vm331_vm1 = vcmask 64512  }
  0x57   : > { %595 = vmatprep.subr.mxu1 %v826_v1  ;;  %597 = vmatprep.mubr.msk.f32.mxu1 %vm825_vm0, %v826_v1  ;;  %v604_v7 = vpack.c.bf16 %v247_v6, %v246_v4  ;;  %v249_v9 = vld [vmem:[#allocation5 + $0x28] sm:$0xff]  ;;  %v250_v11 = vld [vmem:[#allocation5 + $0x30] sm:$0xff]  ;;  %v251_v12 = vld [vmem:[#allocation5 + $0x38] sm:$0xff]  ;;  %v406_v31 = vand.u32 127, %v405_v30  ;;  %v411_v32 = vshrl.u32 %v405_v30, 7  ;;  %s538_s14 = sshll.u32 %s874_s19, 7 }
  0x58   : > { %602 = vmatpush3.bf16.msra.mxu0 %v601_v5  ;;  %v607_v10 = vpack.c.bf16 %v249_v9, %v248_v8  ;;  %v610_v13 = vpack.c.bf16 %v251_v12, %v250_v11  ;;  %v252_v14 = vld [vmem:[#allocation5 + $0x40] sm:$0xff]  ;;  %v253_v15 = vld [vmem:[#allocation5 + $0x48] sm:$0xff]  ;;  %v254_v17 = vld [vmem:[#allocation5 + $0x50] sm:$0xff]  ;;  %s240_s21 = scalar_select %p239_p4, %s874_s19, 1 }
  0x59   : > { %603 = vmatprep.subr.bf16.mxu0 %v824_v0  ;;  %v613_v16 = vpack.c.bf16 %v253_v15, %v252_v14  ;;  %v255_v18 = vld [vmem:[#allocation5 + $0x58] sm:$0xff]  ;;  %v256_v20 = vld [vmem:[#allocation5 + $0x60] sm:$0xff]  ;;  %v257_v21 = vld [vmem:[#allocation5 + $0x68] sm:$0xff]  ;;  %vm407_vm2 = vcmp.lt.s32.totalorder %v406_v31, 2  ;;  %v412_v35 = vsub.s32 0, %v411_v32  ;;  %s238_s20 = scalar_lea.vmem [#allocation7], %s532_s11  ;;  %s1020_s26 = scalar_lea.hbm %s1068_s4, %s538_s14 }
  0x5a   : > { %v616_v19 = vpack.c.bf16 %v255_v18, %v254_v17  ;;  %v619_v22 = vpack.c.bf16 %v257_v21, %v256_v20  ;;  %v258_v23 = vld [vmem:[#allocation5 + $0x70] sm:$0xff]  ;;  %v259_v24 = vld [vmem:[#allocation5 + $0x78] sm:$0xff]  ;;  %s241_s28 = scalar_lea.vmem %s1065_s1, %s240_s21  ;;  %s436_s6 = sshll.u32 %s238_s20, 4  ;;  %s1022_s6 = int_to_ptr.vmem [resolvable:$true] %s436_s6 }
  0x5b   : > { %v622_v25 = vpack.c.bf16 %v259_v24, %v258_v23  ;;  %v242_v26 = vld [vmem:[%s995_s13] sm:$0xff]  ;;  %s423_s8 = scalar_lea.sflag [#allocation4], %s989_s25  ;;  %s748_s12 = scalar_lea.vmem %s1022_s6, 128 }
  0x5c   : > { %605 = vmatpush3.bf16.msra.mxu0 %v604_v7  ;;  %v243_v27 = vld [vmem:[%s241_s28] sm:$0x1]  ;;  %p749_p6 = scmp.ne.s32.totalorder %s1022_s6, %s748_s12  ;;  %s827_s19 = smov [#allocation7]  }
  0x5d   : > { %606 = vmatprep.subr.bf16.mxu0 %v824_v0  ;;  %v260_v33 = vld [vmem:[%s1067_s3] sm:$0x1]  ;;  %s752_s11 = sshll.u32 %s827_s19, 4  ;;  %s753_s11 = int_to_ptr.vmem [resolvable:$false] %s752_s11 }
  0x5e   : > { %p750_p8 = pnand %p749_p6, %p944_p12  ;;  %s754_s13 = scalar_lea.vmem %s753_s11, 256 }
  0x5f   : > { %p755_p13 = scmp.lt.s32.totalorder %s1022_s6, %s753_s11  ;;  %p756_p3 = scmp.lt.s32.totalorder %s754_s13, %s748_s12 }
  0x60   : > { %608 = vmatpush3.bf16.msra.mxu0 %v607_v10  ;;  %p751_p10 = pneg %p750_p8 }
  0x61   : > { %609 = vmatprep.subr.bf16.mxu0 %v824_v0  ;;  %p757_p7 = por %p756_p3, %p755_p13 }
  0x63   : > { %p758_p9 = pnand %p757_p7, %p751_p10 }
  0x64   : > { %611 = vmatpush3.bf16.msra.mxu0 %v610_v13 }
  0x65   : > { %612 = vmatprep.subr.bf16.mxu0 %v824_v0 }
  0x68   : > { %614 = vmatpush3.bf16.msra.mxu0 %v613_v16 }
  0x69   : > { %615 = vmatprep.subr.bf16.mxu0 %v824_v0 }
  0x6c   : > { %617 = vmatpush3.bf16.msra.mxu0 %v616_v19 }
  0x6d   : > { %618 = vmatprep.subr.bf16.mxu0 %v824_v0 }
  0x70   : > { %620 = vmatpush3.bf16.msra.mxu0 %v619_v22 }
  0x71   : > { %621 = vmatprep.subr.bf16.mxu0 %v824_v0 }
  0x74   : > { %623 = vmatpush3.bf16.msra.mxu0 %v622_v25 }
  0x77   : > { %593 = vmatmul.mubr.f32.vlgmr.msra.gmra.mrb[0].mxu0 %v242_v26 }
 0x14a   : > { %v327_v28 = vpop.f32.mrb[0].mxu0 }
 0x14b   : > { %v594_v29 = vpop.f32.mrb[1].mxu0  ;;  %596 = vmatpush3.msra.mxu1 %v327_v28 }
 0x14c   : > { %598 = vmatmul.mubr.msk.f32.vlgmr.msra.gmra.mrb[0].mxu1 %vm331_vm1, %v243_v27 }
 0x21f   : > { %v401_v34 = vpop.f32.mrb[0].mxu1 }
 0x220   : > { %v408_v36 = vsel %vm407_vm2, 0.0, %v401_v34  ;;  %v599_v37 = vpop.f32.mrb[1].mxu1 }
 0x221   : > { %v409_v38 = vadd.f32 %v408_v36, %v260_v33 }
 0x223   : > { %v413_v39 = vrot.slane %v409_v38, %v412_v35 }
 0x225   : > { %v414_v40 = vadd.f32 %v413_v39, %v327_v28 }
 0x227   : > { %v536_v41 = vmul.f32 -1.442695, %v414_v40 }
 0x229   : > { %686 = vpow2.f32 %v536_v41 }
 0x233   : > { %v687_v42 = vpop.eup %686 }
 0x234   : > { %v418_v43 = vadd.f32 1.0, %v687_v42 }
 0x236   : > { %688 = vrcp.f32 %v418_v43 }
 0x240   : > { %v689_v44 = vpop.eup %688 }
 0x241   : > { %421 = vst [vmem:[%s238_s20] sm:$0xff] %v689_v44 }
 0x242   : > { %761 = shalt.err (!%p758_p9)
}
 0x243   : > { %s762_s25 = scalar_lea.hbm %s1020_s26, 128  ;;  %s766_s9 = scalar_lea.hbm %s1068_s4, 256 }
 0x244   : > { %p763_p2 = scmp.ne.s32.totalorder %s1020_s26, %s762_s25  ;;  %p767_p11 = scmp.lt.u32.totalorder %s1020_s26, %s1068_s4 }
 0x245   : > { %p768_p1 = scmp.lt.u32.totalorder %s766_s9, %s762_s25  ;;  %p770_p6 = scmp.lt.u32.totalorder %s762_s25, %s1020_s26 }
 0x246   : > { %p764_p5 = pnand %p763_p2, %p944_p12 }
 0x247   : > { %p769_p4 = por %p768_p1, %p767_p11 }
 0x248   : > { %p765_p0 = pneg %p764_p5 }
 0x249   : > { %p771_p8 = por %p770_p6, %p769_p4 }
 0x24b   : > { %p772_p10 = pnand %p771_p8, %p765_p0 }
 0x24d   : > { %775 = shalt.err (!%p772_p10)
}
 0x24e   : > { %630 = dma.vmem_to_hbm [thread:$0]  (%p944_p12), %s1022_s6, 128, %s1020_s26, %s423_s8  }
 0x24f PF: > { %s448_s10 = sand.u32 1, %s806_s15   ;;  %p1083_p13 = scmp.ne.s32.totalorder %s1073_s22, 0 }
 0x250   : > { %p1084_p3 = scmp.ge.s32.totalorder %s818_s18, 2  ;;  %s449_s14 = scalar_lea.sflag [#allocation4], %s448_s10 }
 0x252   : > { %p641_p7 = pnand %p1084_p3, %p1083_p13 }
 0x254   : > { %801 = dma.done.wait (!%p641_p7), %s449_s14, 128  }
 0x255   : > { %803 = vsyncadd (!%p641_p7), %s449_s14, 4294967168  ;;  %p18_p9 = scmp.ge.s32.totalorder %s909_s27, 4   ;;  %s1085_s15 = smov %s810_s16 }
 0x256   : > { %s1086_s16 = smov %s814_s17  ;;  %s1087_s17 = smov %s940_s24 }
 0x257   : > { %s1088_s18 = smov %s909_s27  ;;  %20 = sbr.rel (!%p18_p9) target bundleno = 6 (0x6), region = 88 }
 0x25e   :  { %454 = vsyncpa [#allocation3], 1 }
 0x25f   :  { %456 = vsyncpa [#allocation3 + $0x1], 1 }
 0x260   :  { %457 = vsyncpa [#allocation6], 1 }
 0x261   :  { %458 = vsyncpa [#allocation4], 1 }
 0x262   :  { %460 = vsyncpa [#allocation4 + $0x1], 1 }

</bundles_post_ra>
